<compile_context>
chip_gen: v7x
topology: tpu7x:2x2x1
jax: 0.10.0
libtpu: 0.0.40
codegen_flags: <defaults>
</compile_context>

<pallas_src>
import math

import jax
import jax.numpy as jnp
from jax.experimental import pallas as pl
from jax.experimental.pallas import tpu as pltpu


def _layer_norm(x, gamma, beta, eps=1e-5):
    # PyTorch LayerNorm: biased variance over the last dim, eps inside sqrt.
    mu = jnp.mean(x, axis=-1, keepdims=True)
    xc = x - mu
    var = jnp.mean(xc * xc, axis=-1, keepdims=True)
    return xc * jax.lax.rsqrt(var + eps) * gamma + beta


def _softly_masked_attention_kernel(
    q_ref, k_ref, mask_ref,
    wq_ref, bq_ref, wk_ref, bk_ref,
    wv1_ref, bv1_ref, wv2_ref, bv2_ref,
    gamma_ref, beta_ref,
    o_ref,
    qln_ref, m_ref, l_ref, acc_ref,
):
    kv = pl.program_id(1)
    nkv = pl.num_programs(1)

    bt, nq, dq = q_ref.shape
    _, tk, dk = k_ref.shape
    h = wq_ref.shape[-1]
    dv = wv2_ref.shape[-1]
    cdt = qln_ref.dtype                      # MXU operand dtype (bf16 by default)

    gamma = gamma_ref[...]
    beta = beta_ref[...]

    # ---- once per batch block: Q projection + LayerNorm, reset accumulators ----
    @pl.when(kv == 0)
    def _init():
        # Batch-flatten so the projection matmul has Bt*Nq rows (fills MXU M dim).
        q2d = q_ref[...].reshape(bt * nq, dq).astype(cdt)
        qp = jnp.dot(q2d, wq_ref[...], preferred_element_type=jnp.float32) + bq_ref[...]
        q_ln = _layer_norm(qp, gamma, beta)
        # Fold 1/sqrt(h) into q_ln: one [Bt*Nq, h] multiply instead of [Nq, Nk].
        q_ln = q_ln * (1.0 / math.sqrt(h))
        qln_ref[...] = q_ln.reshape(bt, nq, h).astype(cdt)
        m_ref[...] = jnp.full(m_ref.shape, -jnp.inf, dtype=m_ref.dtype)
        l_ref[...] = jnp.zeros_like(l_ref)
        acc_ref[...] = jnp.zeros_like(acc_ref)

    # ---- per (batch, kv) tile: K projection + LayerNorm, 2-layer ReLU V MLP ----
    k2d = k_ref[...].reshape(bt * tk, dk).astype(cdt)
    kp = jnp.dot(k2d, wk_ref[...], preferred_element_type=jnp.float32) + bk_ref[...]
    k_ln = _layer_norm(kp, gamma, beta).reshape(bt, tk, h).astype(cdt)

    vh = jnp.maximum(
        jnp.dot(k2d, wv1_ref[...], preferred_element_type=jnp.float32) + bv1_ref[...], 0.0)
    v = jnp.maximum(
        jnp.dot(vh.astype(cdt), wv2_ref[...], preferred_element_type=jnp.float32) + bv2_ref[...],
        0.0)
    v = v.reshape(bt, tk, dv).astype(cdt)

    # Scores: contract the last dims directly (no explicit transpose / XLU pass).
    scores = jnp.einsum("bqh,bkh->bqk", qln_ref[...], k_ln,
                        preferred_element_type=jnp.float32)
    scores = scores + jnp.log(mask_ref[...])          # [Bt,1,tk] broadcasts over q

    # Online (flash) softmax accumulation over kv tiles.
    m_prev = m_ref[...]
    m_new = jnp.maximum(m_prev, jnp.max(scores, axis=-1, keepdims=True))
    alpha = jnp.exp(m_prev - m_new)
    p = jnp.exp(scores - m_new)
    l_ref[...] = alpha * l_ref[...] + jnp.sum(p, axis=-1, keepdims=True)
    pv = jnp.einsum("bqk,bkd->bqd", p.astype(cdt), v,
                    preferred_element_type=jnp.float32)
    acc_ref[...] = alpha * acc_ref[...] + pv
    m_ref[...] = m_new

    # ---- last kv tile: normalize (EUP reciprocal) and emit the output block ----
    @pl.when(kv == nkv - 1)
    def _finalize():
        inv_l = pl.reciprocal(l_ref[...], approx=True)
        # TODO(synk): for d_v < 128 a lane-dense [B, Nq*d_v] output slab would avoid
        # masked partial stores; kept [B, Nq, d_v] to keep in-kernel reshapes
        # tile-aligned and lowering-safe.
        o_ref[...] = (acc_ref[...] * inv_l).astype(o_ref.dtype)


def softly_masked_attention(Q, K, mask_weights, params, *,
                            bt_max=8, tk_max=512,
                            compute_dtype=jnp.bfloat16):
    """Q: [B, Nq, d_q], K: [B, Nk, d_k], mask_weights: [B, Nk] -> [B, Nq, d_v]."""
    B, Nq, d_q = Q.shape
    _, Nk, d_k = K.shape
    h = params["wq"].shape[1]
    d_v = params["wv2"].shape[1]
    out_dtype = Q.dtype

    # Batch tile: largest divisor of B not exceeding bt_max.
    bt = max(d for d in range(1, min(bt_max, B) + 1) if B % d == 0)
    # KV tile: multiple of 128 (lane/sublane friendly) or the full Nk.
    # Default sized conservatively for v7x's 64 MiB VMEM (inputs double-buffered).
    tk = tk_max if (Nk > tk_max and Nk % tk_max == 0) else Nk
    nb, nkv = B // bt, Nk // tk

    mask3 = mask_weights.astype(jnp.float32).reshape(B, 1, Nk)

    # bf16 weights: full-rate MXU and halved weight DMA; biases / LN params stay f32.
    wq = params["wq"].astype(compute_dtype)
    wk = params["wk"].astype(compute_dtype)
    wv1 = params["wv1"].astype(compute_dtype)
    wv2 = params["wv2"].astype(compute_dtype)
    bq = params["bq"].astype(jnp.float32)
    bk = params["bk"].astype(jnp.float32)
    bv1 = params["bv1"].astype(jnp.float32)
    bv2 = params["bv2"].astype(jnp.float32)
    gamma = params["gamma"].astype(jnp.float32)
    beta = params["beta"].astype(jnp.float32)

    def param_spec(shape):
        # Constant block index -> DMA'd once and re-used across all grid steps.
        return pl.BlockSpec(shape, lambda b, kv: (0,) * len(shape))

    in_specs = [
        pl.BlockSpec((bt, Nq, d_q), lambda b, kv: (b, 0, 0)),    # Q (kv-invariant)
        pl.BlockSpec((bt, tk, d_k), lambda b, kv: (b, kv, 0)),   # K
        pl.BlockSpec((bt, 1, tk), lambda b, kv: (b, 0, kv)),     # mask
        param_spec((d_q, h)), param_spec((1, h)),                # W_q, b_q
        param_spec((d_k, h)), param_spec((1, h)),                # W_k, b_k
        param_spec((d_k, h)), param_spec((1, h)),                # W_v[0], b_v[0]
        param_spec((h, d_v)), param_spec((1, d_v)),              # W_v[2], b_v[2]
        param_spec((1, h)), param_spec((1, h)),                  # LN gamma, beta
    ]
    out_spec = pl.BlockSpec((bt, Nq, d_v), lambda b, kv: (b, 0, 0))

    scratch_shapes = [
        pltpu.VMEM((bt, Nq, h), compute_dtype),    # cached pre-scaled q_ln
        pltpu.VMEM((bt, Nq, 1), jnp.float32),      # running row max
        pltpu.VMEM((bt, Nq, 1), jnp.float32),      # running row sum
        pltpu.VMEM((bt, Nq, d_v), jnp.float32),    # output accumulator
    ]

    flops = 2 * B * (Nq * d_q * h + 2 * Nk * d_k * h + Nk * h * d_v
                     + Nq * Nk * h + Nq * Nk * d_v)
    transcendentals = B * (Nq * Nk + Nk + Nq * nkv)
    operands = (Q, K, mask3, wq, bq, wk, bk, wv1, bv1, wv2, bv2, gamma, beta)
    bytes_accessed = sum(int(x.size) * x.dtype.itemsize for x in operands) \
        + B * Nq * d_v * jnp.dtype(out_dtype).itemsize

    return pl.pallas_call(
        _softly_masked_attention_kernel,
        out_shape=jax.ShapeDtypeStruct((B, Nq, d_v), out_dtype),
        grid_spec=pltpu.PrefetchScalarGridSpec(
            num_scalar_prefetch=0,
            grid=(nb, nkv),
            in_specs=in_specs,
            out_specs=out_spec,
            scratch_shapes=scratch_shapes,
        ),
        compiler_params=pltpu.CompilerParams(
            dimension_semantics=("parallel", "arbitrary"),
            vmem_limit_bytes=64 * 1024 * 1024,
        ),
        cost_estimate=pl.CostEstimate(
            flops=int(flops),
            transcendentals=int(transcendentals),
            bytes_accessed=int(bytes_accessed),
        ),
    )(*operands)


def _reference(Q, K, mask_weights, params, compute_dtype=jnp.float32):
    """Pure-JAX forward. compute_dtype=float32 is the exact PyTorch module;
    compute_dtype=bfloat16 mirrors the kernel's mixed-precision recipe."""
    cd = compute_dtype
    f32 = jnp.float32
    h = params["wq"].shape[1]
    gamma, beta = params["gamma"], params["beta"]

    def ln(x):
        mu = jnp.mean(x, -1, keepdims=True)
        var = jnp.mean((x - mu) ** 2, -1, keepdims=True)
        return (x - mu) / jnp.sqrt(var + 1e-5) * gamma + beta

    Qc, Kc = Q.astype(cd), K.astype(cd)
    wq, wk = params["wq"].astype(cd), params["wk"].astype(cd)
    wv1, wv2 = params["wv1"].astype(cd), params["wv2"].astype(cd)

    qp = jnp.einsum("bqd,dh->bqh", Qc, wq, preferred_element_type=f32) + params["bq"]
    kp = jnp.einsum("bkd,dh->bkh", Kc, wk, preferred_element_type=f32) + params["bk"]
    q_ln = (ln(qp) * (1.0 / math.sqrt(h))).astype(cd)
    k_ln = ln(kp).astype(cd)

    vh = jnp.maximum(
        jnp.einsum("bkd,dh->bkh", Kc, wv1, preferred_element_type=f32) + params["bv1"], 0.0)
    v = jnp.maximum(
        jnp.einsum("bkh,hd->bkd", vh.astype(cd), wv2, preferred_element_type=f32) + params["bv2"],
        0.0).astype(cd)

    scores = jnp.einsum("bqh,bkh->bqk", q_ln, k_ln, preferred_element_type=f32)
    scores = scores + jnp.log(mask_weights.astype(f32))[:, None, :]
    m = jnp.max(scores, -1, keepdims=True)
    p = jnp.exp(scores - m)
    l = jnp.sum(p, -1, keepdims=True)
    out = jnp.einsum("bqk,bkd->bqd", p.astype(cd), v, preferred_element_type=f32)
    return out / l


if __name__ == "__main__":
    # Small, forward-consistent shapes.
    B, Nq, Nk = 2, 8, 8
    d_q, d_k, d_v, h = 16, 16, 32, 32

    key = jax.random.PRNGKey(0)
    keys = jax.random.split(key, 12)

    def linear_init(kw, kb, fan_in, fan_out):
        bound = 1.0 / math.sqrt(fan_in)
        w = jax.random.uniform(kw, (fan_in, fan_out), jnp.float32, -bound, bound)
        b = jax.random.uniform(kb, (1, fan_out), jnp.float32, -bound, bound)
        return w, b

    wq, bq = linear_init(keys[0], keys[1], d_q, h)
    wk, bk = linear_init(keys[2], keys[3], d_k, h)
    wv1, bv1 = linear_init(keys[4], keys[5], d_k, h)
    wv2, bv2 = linear_init(keys[6], keys[7], h, d_v)
    params = dict(
        wq=wq, bq=bq, wk=wk, bk=bk, wv1=wv1, bv1=bv1, wv2=wv2, bv2=bv2,
        gamma=jnp.ones((1, h), jnp.float32),     # nn.LayerNorm default weight
        beta=jnp.zeros((1, h), jnp.float32),     # nn.LayerNorm default bias
    )

    Q = jax.random.normal(keys[8], (B, Nq, d_q), jnp.float32)
    K = jax.random.normal(keys[9], (B, Nk, d_k), jnp.float32)
    # Soft mask weights: positive so log() is finite (as assumed by the module).
    mask_weights = jax.random.uniform(keys[10], (B, Nk), jnp.float32, 0.05, 1.0)

    out = softly_masked_attention(Q, K, mask_weights, params)
    out = jax.block_until_ready(out)
    assert out.shape == (B, Nq, d_v)

    # Structural check vs a reference mirroring the kernel's mixed precision
    # (bf16 MXU operands, f32 accumulation).
    ref_mixed = _reference(Q, K, mask_weights, params, compute_dtype=jnp.bfloat16)
    assert jnp.allclose(out, ref_mixed, atol=2e-2, rtol=2e-2), \
        "mismatch vs mixed-precision reference"

    # Sanity check vs the full-f32, PyTorch-equivalent forward.
    ref_f32 = _reference(Q, K, mask_weights, params, compute_dtype=jnp.float32)
    assert jnp.allclose(out, ref_f32, atol=1e-1, rtol=1e-1), \
        "mismatch vs f32 reference"

    print("KERNEL_OK")
</pallas_src>

<mosaic_0001>
module attributes {stable_mosaic.version = 11 : i64} {
  func.func @_softly_masked_attention_kernel(%arg0: i32, %arg1: i32, %arg2: memref<2x8x16xf32, #tpu.memory_space<vmem>>, %arg3: memref<2x8x16xf32, #tpu.memory_space<vmem>>, %arg4: memref<2x1x8xf32, #tpu.memory_space<vmem>>, %arg5: memref<16x32xbf16, #tpu.memory_space<vmem>>, %arg6: memref<1x32xf32, #tpu.memory_space<vmem>>, %arg7: memref<16x32xbf16, #tpu.memory_space<vmem>>, %arg8: memref<1x32xf32, #tpu.memory_space<vmem>>, %arg9: memref<16x32xbf16, #tpu.memory_space<vmem>>, %arg10: memref<1x32xf32, #tpu.memory_space<vmem>>, %arg11: memref<32x32xbf16, #tpu.memory_space<vmem>>, %arg12: memref<1x32xf32, #tpu.memory_space<vmem>>, %arg13: memref<1x32xf32, #tpu.memory_space<vmem>>, %arg14: memref<1x32xf32, #tpu.memory_space<vmem>>, %arg15: memref<2x8x32xf32, #tpu.memory_space<vmem>>, %arg16: memref<2x8x32xbf16, #tpu.memory_space<vmem>>, %arg17: memref<2x8x1xf32, #tpu.memory_space<vmem>>, %arg18: memref<2x8x1xf32, #tpu.memory_space<vmem>>, %arg19: memref<2x8x32xf32, #tpu.memory_space<vmem>>) attributes {dimension_semantics = [#tpu.dimension_semantics<parallel>, #tpu.dimension_semantics<arbitrary>], iteration_bounds = array<i64: 1, 1>, scalar_prefetch = 0 : i64, scratch_operands = 4 : i64, tpu.core_type = #tpu.core_type<tc>, window_params = [{transform_indices = @transform_0, window_bounds = array<i64: 2, 8, 16>}, {transform_indices = @transform_1, window_bounds = array<i64: 2, 8, 16>}, {transform_indices = @transform_2, window_bounds = array<i64: 2, 1, 8>}, {pipeline_mode = #tpu.pipeline_mode<synchronous>, transform_indices = @transform_3, window_bounds = array<i64: 16, 32>}, {pipeline_mode = #tpu.pipeline_mode<synchronous>, transform_indices = @transform_4, window_bounds = array<i64: 1, 32>}, {pipeline_mode = #tpu.pipeline_mode<synchronous>, transform_indices = @transform_5, window_bounds = array<i64: 16, 32>}, {pipeline_mode = #tpu.pipeline_mode<synchronous>, transform_indices = @transform_6, window_bounds = array<i64: 1, 32>}, {pipeline_mode = #tpu.pipeline_mode<synchronous>, transform_indices = @transform_7, window_bounds = array<i64: 16, 32>}, {pipeline_mode = #tpu.pipeline_mode<synchronous>, transform_indices = @transform_8, window_bounds = array<i64: 1, 32>}, {pipeline_mode = #tpu.pipeline_mode<synchronous>, transform_indices = @transform_9, window_bounds = array<i64: 32, 32>}, {pipeline_mode = #tpu.pipeline_mode<synchronous>, transform_indices = @transform_10, window_bounds = array<i64: 1, 32>}, {pipeline_mode = #tpu.pipeline_mode<synchronous>, transform_indices = @transform_11, window_bounds = array<i64: 1, 32>}, {pipeline_mode = #tpu.pipeline_mode<synchronous>, transform_indices = @transform_12, window_bounds = array<i64: 1, 32>}, {transform_indices = @transform_13, window_bounds = array<i64: 2, 8, 32>}]} {
    %c0 = arith.constant 0 : index
    %c0_0 = arith.constant 0 : index
    %0 = vector.load %arg13[%c0, %c0_0] : memref<1x32xf32, #tpu.memory_space<vmem>>, vector<1x32xf32>
    %c0_1 = arith.constant 0 : index
    %c0_2 = arith.constant 0 : index
    %1 = vector.load %arg14[%c0_1, %c0_2] : memref<1x32xf32, #tpu.memory_space<vmem>>, vector<1x32xf32>
    %c0_i32 = arith.constant 0 : i32
    %2 = arith.cmpi eq, %arg1, %c0_i32 : i32
    %3 = arith.extui %2 : i1 to i32
    %c0_i32_3 = arith.constant 0 : i32
    %4 = arith.cmpi ne, %3, %c0_i32_3 : i32
    scf.if %4 {
      %c0_58 = arith.constant 0 : index
      %c0_59 = arith.constant 0 : index
      %c0_60 = arith.constant 0 : index
      %84 = vector.load %arg2[%c0_58, %c0_59, %c0_60] : memref<2x8x16xf32, #tpu.memory_space<vmem>>, vector<2x8x16xf32>
      %85 = vector.shape_cast %84 : vector<2x8x16xf32> to vector<16x16xf32>
      %86 = arith.truncf %85 : vector<16x16xf32> to vector<16x16xbf16>
      %c0_61 = arith.constant 0 : index
      %c0_62 = arith.constant 0 : index
      %87 = vector.load %arg5[%c0_61, %c0_62] : memref<16x32xbf16, #tpu.memory_space<vmem>>, vector<16x32xbf16>
      %cst_63 = arith.constant dense<0.000000e+00> : vector<16x32xf32>
      %88 = tpu.matmul %86, %87, %cst_63 {dimension_numbers = #tpu.dot_dimension_numbers<[1], [0], [0], [1], [0, 0, 1, 1], [], []>} : vector<16x16xbf16>, vector<16x32xbf16>, vector<16x32xf32> -> vector<16x32xf32>
      %c0_64 = arith.constant 0 : index
      %c0_65 = arith.constant 0 : index
      %89 = vector.load %arg6[%c0_64, %c0_65] : memref<1x32xf32, #tpu.memory_space<vmem>>, vector<1x32xf32>
      %90 = vector.broadcast %89 : vector<1x32xf32> to vector<16x32xf32>
      %91 = arith.addf %88, %90 : vector<16x32xf32>
      %cst_66 = arith.constant dense<0.000000e+00> : vector<16xf32>
      %92 = vector.multi_reduction <add>, %91, %cst_66 [1] : vector<16x32xf32> to vector<16xf32>
      %93 = vector.shape_cast %92 : vector<16xf32> to vector<16x1xf32>
      %cst_67 = arith.constant 3.200000e+01 : f32
      %94 = vector.broadcast %cst_67 : f32 to vector<16x1xf32>
      %95 = arith.divf %93, %94 : vector<16x1xf32>
      %96 = vector.broadcast %95 : vector<16x1xf32> to vector<16x32xf32>
      %97 = arith.subf %91, %96 : vector<16x32xf32>
      %98 = arith.mulf %97, %97 : vector<16x32xf32>
      %cst_68 = arith.constant dense<0.000000e+00> : vector<16xf32>
      %99 = vector.multi_reduction <add>, %98, %cst_68 [1] : vector<16x32xf32> to vector<16xf32>
      %100 = vector.shape_cast %99 : vector<16xf32> to vector<16x1xf32>
      %cst_69 = arith.constant 3.200000e+01 : f32
      %101 = vector.broadcast %cst_69 : f32 to vector<16x1xf32>
      %102 = arith.divf %100, %101 : vector<16x1xf32>
      %cst_70 = arith.constant 9.99999974E-6 : f32
      %103 = vector.broadcast %cst_70 : f32 to vector<16x1xf32>
      %104 = arith.addf %102, %103 : vector<16x1xf32>
      %105 = math.rsqrt %104 : vector<16x1xf32>
      %106 = vector.broadcast %105 : vector<16x1xf32> to vector<16x32xf32>
      %107 = arith.mulf %97, %106 : vector<16x32xf32>
      %108 = vector.broadcast %0 : vector<1x32xf32> to vector<16x32xf32>
      %109 = arith.mulf %107, %108 : vector<16x32xf32>
      %110 = vector.broadcast %1 : vector<1x32xf32> to vector<16x32xf32>
      %111 = arith.addf %109, %110 : vector<16x32xf32>
      %cst_71 = arith.constant 0.176776692 : f32
      %112 = vector.broadcast %cst_71 : f32 to vector<16x32xf32>
      %113 = arith.mulf %111, %112 : vector<16x32xf32>
      %114 = vector.shape_cast %113 : vector<16x32xf32> to vector<2x8x32xf32>
      %115 = arith.truncf %114 : vector<2x8x32xf32> to vector<2x8x32xbf16>
      %c0_72 = arith.constant 0 : index
      %c0_73 = arith.constant 0 : index
      %c0_74 = arith.constant 0 : index
      %116 = vector.load %arg16[%c0_72, %c0_73, %c0_74] : memref<2x8x32xbf16, #tpu.memory_space<vmem>>, vector<2x8x32xbf16>
      tpu.vector_store %arg16[%c0_72, %c0_73, %c0_74], %115 {strides = array<i32>} : memref<2x8x32xbf16, #tpu.memory_space<vmem>>, vector<2x8x32xbf16>,
      %cst_75 = arith.constant 0xFF800000 : f32
      %117 = vector.broadcast %cst_75 : f32 to vector<2x8x1xf32>
      %c0_76 = arith.constant 0 : index
      %c0_77 = arith.constant 0 : index
      %c0_78 = arith.constant 0 : index
      %118 = vector.load %arg17[%c0_76, %c0_77, %c0_78] : memref<2x8x1xf32, #tpu.memory_space<vmem>>, vector<2x8x1xf32>
      tpu.vector_store %arg17[%c0_76, %c0_77, %c0_78], %117 {strides = array<i32>} : memref<2x8x1xf32, #tpu.memory_space<vmem>>, vector<2x8x1xf32>,
      %cst_79 = arith.constant 0.000000e+00 : f32
      %119 = vector.broadcast %cst_79 : f32 to vector<2x8x1xf32>
      %c0_80 = arith.constant 0 : index
      %c0_81 = arith.constant 0 : index
      %c0_82 = arith.constant 0 : index
      %120 = vector.load %arg18[%c0_80, %c0_81, %c0_82] : memref<2x8x1xf32, #tpu.memory_space<vmem>>, vector<2x8x1xf32>
      tpu.vector_store %arg18[%c0_80, %c0_81, %c0_82], %119 {strides = array<i32>} : memref<2x8x1xf32, #tpu.memory_space<vmem>>, vector<2x8x1xf32>,
      %cst_83 = arith.constant 0.000000e+00 : f32
      %121 = vector.broadcast %cst_83 : f32 to vector<2x8x32xf32>
      %c0_84 = arith.constant 0 : index
      %c0_85 = arith.constant 0 : index
      %c0_86 = arith.constant 0 : index
      %122 = vector.load %arg19[%c0_84, %c0_85, %c0_86] : memref<2x8x32xf32, #tpu.memory_space<vmem>>, vector<2x8x32xf32>
      tpu.vector_store %arg19[%c0_84, %c0_85, %c0_86], %121 {strides = array<i32>} : memref<2x8x32xf32, #tpu.memory_space<vmem>>, vector<2x8x32xf32>,
    } else {
    }
    %c0_4 = arith.constant 0 : index
    %c0_5 = arith.constant 0 : index
    %c0_6 = arith.constant 0 : index
    %5 = vector.load %arg3[%c0_4, %c0_5, %c0_6] : memref<2x8x16xf32, #tpu.memory_space<vmem>>, vector<2x8x16xf32>
    %6 = vector.shape_cast %5 : vector<2x8x16xf32> to vector<16x16xf32>
    %7 = arith.truncf %6 : vector<16x16xf32> to vector<16x16xbf16>
    %c0_7 = arith.constant 0 : index
    %c0_8 = arith.constant 0 : index
    %8 = vector.load %arg7[%c0_7, %c0_8] : memref<16x32xbf16, #tpu.memory_space<vmem>>, vector<16x32xbf16>
    %cst = arith.constant dense<0.000000e+00> : vector<16x32xf32>
    %9 = tpu.matmul %7, %8, %cst {dimension_numbers = #tpu.dot_dimension_numbers<[1], [0], [0], [1], [0, 0, 1, 1], [], []>} : vector<16x16xbf16>, vector<16x32xbf16>, vector<16x32xf32> -> vector<16x32xf32>
    %c0_9 = arith.constant 0 : index
    %c0_10 = arith.constant 0 : index
    %10 = vector.load %arg8[%c0_9, %c0_10] : memref<1x32xf32, #tpu.memory_space<vmem>>, vector<1x32xf32>
    %11 = vector.broadcast %10 : vector<1x32xf32> to vector<16x32xf32>
    %12 = arith.addf %9, %11 : vector<16x32xf32>
    %cst_11 = arith.constant dense<0.000000e+00> : vector<16xf32>
    %13 = vector.multi_reduction <add>, %12, %cst_11 [1] : vector<16x32xf32> to vector<16xf32>
    %14 = vector.shape_cast %13 : vector<16xf32> to vector<16x1xf32>
    %cst_12 = arith.constant 3.200000e+01 : f32
    %15 = vector.broadcast %cst_12 : f32 to vector<16x1xf32>
    %16 = arith.divf %14, %15 : vector<16x1xf32>
    %17 = vector.broadcast %16 : vector<16x1xf32> to vector<16x32xf32>
    %18 = arith.subf %12, %17 : vector<16x32xf32>
    %19 = arith.mulf %18, %18 : vector<16x32xf32>
    %cst_13 = arith.constant dense<0.000000e+00> : vector<16xf32>
    %20 = vector.multi_reduction <add>, %19, %cst_13 [1] : vector<16x32xf32> to vector<16xf32>
    %21 = vector.shape_cast %20 : vector<16xf32> to vector<16x1xf32>
    %cst_14 = arith.constant 3.200000e+01 : f32
    %22 = vector.broadcast %cst_14 : f32 to vector<16x1xf32>
    %23 = arith.divf %21, %22 : vector<16x1xf32>
    %cst_15 = arith.constant 9.99999974E-6 : f32
    %24 = vector.broadcast %cst_15 : f32 to vector<16x1xf32>
    %25 = arith.addf %23, %24 : vector<16x1xf32>
    %26 = math.rsqrt %25 : vector<16x1xf32>
    %27 = vector.broadcast %26 : vector<16x1xf32> to vector<16x32xf32>
    %28 = arith.mulf %18, %27 : vector<16x32xf32>
    %29 = vector.broadcast %0 : vector<1x32xf32> to vector<16x32xf32>
    %30 = arith.mulf %28, %29 : vector<16x32xf32>
    %31 = vector.broadcast %1 : vector<1x32xf32> to vector<16x32xf32>
    %32 = arith.addf %30, %31 : vector<16x32xf32>
    %33 = vector.shape_cast %32 : vector<16x32xf32> to vector<2x8x32xf32>
    %34 = arith.truncf %33 : vector<2x8x32xf32> to vector<2x8x32xbf16>
    %c0_16 = arith.constant 0 : index
    %c0_17 = arith.constant 0 : index
    %35 = vector.load %arg9[%c0_16, %c0_17] : memref<16x32xbf16, #tpu.memory_space<vmem>>, vector<16x32xbf16>
    %cst_18 = arith.constant dense<0.000000e+00> : vector<16x32xf32>
    %36 = tpu.matmul %7, %35, %cst_18 {dimension_numbers = #tpu.dot_dimension_numbers<[1], [0], [0], [1], [0, 0, 1, 1], [], []>} : vector<16x16xbf16>, vector<16x32xbf16>, vector<16x32xf32> -> vector<16x32xf32>
    %c0_19 = arith.constant 0 : index
    %c0_20 = arith.constant 0 : index
    %37 = vector.load %arg10[%c0_19, %c0_20] : memref<1x32xf32, #tpu.memory_space<vmem>>, vector<1x32xf32>
    %38 = vector.broadcast %37 : vector<1x32xf32> to vector<16x32xf32>
    %39 = arith.addf %36, %38 : vector<16x32xf32>
    %cst_21 = arith.constant 0.000000e+00 : f32
    %40 = vector.broadcast %cst_21 : f32 to vector<16x32xf32>
    %41 = arith.maximumf %39, %40 : vector<16x32xf32>
    %42 = arith.truncf %41 : vector<16x32xf32> to vector<16x32xbf16>
    %c0_22 = arith.constant 0 : index
    %c0_23 = arith.constant 0 : index
    %43 = vector.load %arg11[%c0_22, %c0_23] : memref<32x32xbf16, #tpu.memory_space<vmem>>, vector<32x32xbf16>
    %cst_24 = arith.constant dense<0.000000e+00> : vector<16x32xf32>
    %44 = tpu.matmul %42, %43, %cst_24 {dimension_numbers = #tpu.dot_dimension_numbers<[1], [0], [0], [1], [0, 0, 1, 1], [], []>} : vector<16x32xbf16>, vector<32x32xbf16>, vector<16x32xf32> -> vector<16x32xf32>
    %c0_25 = arith.constant 0 : index
    %c0_26 = arith.constant 0 : index
    %45 = vector.load %arg12[%c0_25, %c0_26] : memref<1x32xf32, #tpu.memory_space<vmem>>, vector<1x32xf32>
    %46 = vector.broadcast %45 : vector<1x32xf32> to vector<16x32xf32>
    %47 = arith.addf %44, %46 : vector<16x32xf32>
    %cst_27 = arith.constant 0.000000e+00 : f32
    %48 = vector.broadcast %cst_27 : f32 to vector<16x32xf32>
    %49 = arith.maximumf %47, %48 : vector<16x32xf32>
    %50 = vector.shape_cast %49 : vector<16x32xf32> to vector<2x8x32xf32>
    %51 = arith.truncf %50 : vector<2x8x32xf32> to vector<2x8x32xbf16>
    %c0_28 = arith.constant 0 : index
    %c0_29 = arith.constant 0 : index
    %c0_30 = arith.constant 0 : index
    %52 = vector.load %arg16[%c0_28, %c0_29, %c0_30] : memref<2x8x32xbf16, #tpu.memory_space<vmem>>, vector<2x8x32xbf16>
    "tpu.trace_start"() <{level = 10 : i32, message = "bqh,bkh->bqk"}> : () -> ()
    %cst_31 = arith.constant dense<0.000000e+00> : vector<2x8x8xf32>
    %53 = tpu.matmul %52, %34, %cst_31 {dimension_numbers = #tpu.dot_dimension_numbers<[2], [2], [1], [1], [0, 0, 0, 1, 1, 1], [0], [0]>} : vector<2x8x32xbf16>, vector<2x8x32xbf16>, vector<2x8x8xf32> -> vector<2x8x8xf32>
    "tpu.trace_stop"() : () -> ()
    %c0_32 = arith.constant 0 : index
    %c0_33 = arith.constant 0 : index
    %c0_34 = arith.constant 0 : index
    %54 = vector.load %arg4[%c0_32, %c0_33, %c0_34] : memref<2x1x8xf32, #tpu.memory_space<vmem>>, vector<2x1x8xf32>
    %55 = math.log %54 : vector<2x1x8xf32>
    %56 = vector.broadcast %55 : vector<2x1x8xf32> to vector<2x8x8xf32>
    %57 = arith.addf %53, %56 : vector<2x8x8xf32>
    %c0_35 = arith.constant 0 : index
    %c0_36 = arith.constant 0 : index
    %c0_37 = arith.constant 0 : index
    %58 = vector.load %arg17[%c0_35, %c0_36, %c0_37] : memref<2x8x1xf32, #tpu.memory_space<vmem>>, vector<2x8x1xf32>
    %cst_38 = arith.constant dense<0xFF800000> : vector<2x8xf32>
    %59 = vector.multi_reduction <maximumf>, %57, %cst_38 [2] : vector<2x8x8xf32> to vector<2x8xf32>
    %60 = vector.shape_cast %59 : vector<2x8xf32> to vector<2x8x1xf32>
    %61 = arith.maximumf %58, %60 : vector<2x8x1xf32>
    %62 = arith.subf %58, %61 : vector<2x8x1xf32>
    %63 = math.exp %62 : vector<2x8x1xf32>
    %64 = vector.broadcast %61 : vector<2x8x1xf32> to vector<2x8x8xf32>
    %65 = arith.subf %57, %64 : vector<2x8x8xf32>
    %66 = math.exp %65 : vector<2x8x8xf32>
    %c0_39 = arith.constant 0 : index
    %c0_40 = arith.constant 0 : index
    %c0_41 = arith.constant 0 : index
    %67 = vector.load %arg18[%c0_39, %c0_40, %c0_41] : memref<2x8x1xf32, #tpu.memory_space<vmem>>, vector<2x8x1xf32>
    %68 = arith.mulf %63, %67 : vector<2x8x1xf32>
    %cst_42 = arith.constant dense<0.000000e+00> : vector<2x8xf32>
    %69 = vector.multi_reduction <add>, %66, %cst_42 [2] : vector<2x8x8xf32> to vector<2x8xf32>
    %70 = vector.shape_cast %69 : vector<2x8xf32> to vector<2x8x1xf32>
    %71 = arith.addf %68, %70 : vector<2x8x1xf32>
    %c0_43 = arith.constant 0 : index
    %c0_44 = arith.constant 0 : index
    %c0_45 = arith.constant 0 : index
    %72 = vector.load %arg18[%c0_43, %c0_44, %c0_45] : memref<2x8x1xf32, #tpu.memory_space<vmem>>, vector<2x8x1xf32>
    tpu.vector_store %arg18[%c0_43, %c0_44, %c0_45], %71 {strides = array<i32>} : memref<2x8x1xf32, #tpu.memory_space<vmem>>, vector<2x8x1xf32>,
    %73 = arith.truncf %66 : vector<2x8x8xf32> to vector<2x8x8xbf16>
    "tpu.trace_start"() <{level = 10 : i32, message = "bqk,bkd->bqd"}> : () -> ()
    %cst_46 = arith.constant dense<0.000000e+00> : vector<2x8x32xf32>
    %74 = tpu.matmul %73, %51, %cst_46 {dimension_numbers = #tpu.dot_dimension_numbers<[2], [1], [1], [2], [0, 0, 0, 1, 1, 2], [0], [0]>} : vector<2x8x8xbf16>, vector<2x8x32xbf16>, vector<2x8x32xf32> -> vector<2x8x32xf32>
    "tpu.trace_stop"() : () -> ()
    %c0_47 = arith.constant 0 : index
    %c0_48 = arith.constant 0 : index
    %c0_49 = arith.constant 0 : index
    %75 = vector.load %arg19[%c0_47, %c0_48, %c0_49] : memref<2x8x32xf32, #tpu.memory_space<vmem>>, vector<2x8x32xf32>
    %76 = vector.broadcast %63 : vector<2x8x1xf32> to vector<2x8x32xf32>
    %77 = arith.mulf %76, %75 : vector<2x8x32xf32>
    %78 = arith.addf %77, %74 : vector<2x8x32xf32>
    %c0_50 = arith.constant 0 : index
    %c0_51 = arith.constant 0 : index
    %c0_52 = arith.constant 0 : index
    %79 = vector.load %arg19[%c0_50, %c0_51, %c0_52] : memref<2x8x32xf32, #tpu.memory_space<vmem>>, vector<2x8x32xf32>
    tpu.vector_store %arg19[%c0_50, %c0_51, %c0_52], %78 {strides = array<i32>} : memref<2x8x32xf32, #tpu.memory_space<vmem>>, vector<2x8x32xf32>,
    %c0_53 = arith.constant 0 : index
    %c0_54 = arith.constant 0 : index
    %c0_55 = arith.constant 0 : index
    %80 = vector.load %arg17[%c0_53, %c0_54, %c0_55] : memref<2x8x1xf32, #tpu.memory_space<vmem>>, vector<2x8x1xf32>
    tpu.vector_store %arg17[%c0_53, %c0_54, %c0_55], %61 {strides = array<i32>} : memref<2x8x1xf32, #tpu.memory_space<vmem>>, vector<2x8x1xf32>,
    %c0_i32_56 = arith.constant 0 : i32
    %81 = arith.cmpi eq, %arg1, %c0_i32_56 : i32
    %82 = arith.extui %81 : i1 to i32
    %c0_i32_57 = arith.constant 0 : i32
    %83 = arith.cmpi ne, %82, %c0_i32_57 : i32
    scf.if %83 {
      %c0_58 = arith.constant 0 : index
      %c0_59 = arith.constant 0 : index
      %c0_60 = arith.constant 0 : index
      %84 = vector.load %arg18[%c0_58, %c0_59, %c0_60] : memref<2x8x1xf32, #tpu.memory_space<vmem>>, vector<2x8x1xf32>
      %85 = tpu.reciprocal %84 {approx = true} : vector<2x8x1xf32> -> vector<2x8x1xf32>
      %c0_61 = arith.constant 0 : index
      %c0_62 = arith.constant 0 : index
      %c0_63 = arith.constant 0 : index
      %86 = vector.load %arg19[%c0_61, %c0_62, %c0_63] : memref<2x8x32xf32, #tpu.memory_space<vmem>>, vector<2x8x32xf32>
      %87 = vector.broadcast %85 : vector<2x8x1xf32> to vector<2x8x32xf32>
      %88 = arith.mulf %86, %87 : vector<2x8x32xf32>
      %c0_64 = arith.constant 0 : index
      %c0_65 = arith.constant 0 : index
      %c0_66 = arith.constant 0 : index
      %89 = vector.load %arg15[%c0_64, %c0_65, %c0_66] : memref<2x8x32xf32, #tpu.memory_space<vmem>>, vector<2x8x32xf32>
      tpu.vector_store %arg15[%c0_64, %c0_65, %c0_66], %88 {strides = array<i32>} : memref<2x8x32xf32, #tpu.memory_space<vmem>>, vector<2x8x32xf32>,
    } else {
    }
    return
  }
  func.func @transform_0(%arg0: i32, %arg1: i32) -> (i32, i32, i32) {
    %c0_i32 = arith.constant 0 : i32
    %c0_i32_0 = arith.constant 0 : i32
    %c0_i32_1 = arith.constant 0 : i32
    return %arg0, %c0_i32, %c0_i32_0 : i32, i32, i32
  }
  func.func @transform_1(%arg0: i32, %arg1: i32) -> (i32, i32, i32) {
    %c0_i32 = arith.constant 0 : i32
    %c0_i32_0 = arith.constant 0 : i32
    return %arg0, %arg1, %c0_i32 : i32, i32, i32
  }
  func.func @transform_2(%arg0: i32, %arg1: i32) -> (i32, i32, i32) {
    %c0_i32 = arith.constant 0 : i32
    %c0_i32_0 = arith.constant 0 : i32
    return %arg0, %c0_i32, %arg1 : i32, i32, i32
  }
  func.func @transform_3(%arg0: i32, %arg1: i32) -> (i32, i32) {
    %c0_i32 = arith.constant 0 : i32
    %c0_i32_0 = arith.constant 0 : i32
    %c0_i32_1 = arith.constant 0 : i32
    return %c0_i32, %c0_i32_0 : i32, i32
  }
  func.func @transform_4(%arg0: i32, %arg1: i32) -> (i32, i32) {
    %c0_i32 = arith.constant 0 : i32
    %c0_i32_0 = arith.constant 0 : i32
    %c0_i32_1 = arith.constant 0 : i32
    return %c0_i32, %c0_i32_0 : i32, i32
  }
  func.func @transform_5(%arg0: i32, %arg1: i32) -> (i32, i32) {
    %c0_i32 = arith.constant 0 : i32
    %c0_i32_0 = arith.constant 0 : i32
    %c0_i32_1 = arith.constant 0 : i32
    return %c0_i32, %c0_i32_0 : i32, i32
  }
  func.func @transform_6(%arg0: i32, %arg1: i32) -> (i32, i32) {
    %c0_i32 = arith.constant 0 : i32
    %c0_i32_0 = arith.constant 0 : i32
    %c0_i32_1 = arith.constant 0 : i32
    return %c0_i32, %c0_i32_0 : i32, i32
  }
  func.func @transform_7(%arg0: i32, %arg1: i32) -> (i32, i32) {
    %c0_i32 = arith.constant 0 : i32
    %c0_i32_0 = arith.constant 0 : i32
    %c0_i32_1 = arith.constant 0 : i32
    return %c0_i32, %c0_i32_0 : i32, i32
  }
  func.func @transform_8(%arg0: i32, %arg1: i32) -> (i32, i32) {
    %c0_i32 = arith.constant 0 : i32
    %c0_i32_0 = arith.constant 0 : i32
    %c0_i32_1 = arith.constant 0 : i32
    return %c0_i32, %c0_i32_0 : i32, i32
  }
  func.func @transform_9(%arg0: i32, %arg1: i32) -> (i32, i32) {
    %c0_i32 = arith.constant 0 : i32
    %c0_i32_0 = arith.constant 0 : i32
    %c0_i32_1 = arith.constant 0 : i32
    return %c0_i32, %c0_i32_0 : i32, i32
  }
  func.func @transform_10(%arg0: i32, %arg1: i32) -> (i32, i32) {
    %c0_i32 = arith.constant 0 : i32
    %c0_i32_0 = arith.constant 0 : i32
    %c0_i32_1 = arith.constant 0 : i32
    return %c0_i32, %c0_i32_0 : i32, i32
  }
  func.func @transform_11(%arg0: i32, %arg1: i32) -> (i32, i32) {
    %c0_i32 = arith.constant 0 : i32
    %c0_i32_0 = arith.constant 0 : i32
    %c0_i32_1 = arith.constant 0 : i32
    return %c0_i32, %c0_i32_0 : i32, i32
  }
  func.func @transform_12(%arg0: i32, %arg1: i32) -> (i32, i32) {
    %c0_i32 = arith.constant 0 : i32
    %c0_i32_0 = arith.constant 0 : i32
    %c0_i32_1 = arith.constant 0 : i32
    return %c0_i32, %c0_i32_0 : i32, i32
  }
  func.func @transform_13(%arg0: i32, %arg1: i32) -> (i32, i32, i32) {
    %c0_i32 = arith.constant 0 : i32
    %c0_i32_0 = arith.constant 0 : i32
    %c0_i32_1 = arith.constant 0 : i32
    return %arg0, %c0_i32, %c0_i32_0 : i32, i32, i32
  }
}

</mosaic_0001>

<bundles_post_ra>
// kernel: tpu_custom_call.1
= control target key start
LH: loop header
LB: loop body
LE: loop exit
PB: predicated region body
PF: predicated region fallthrough
CT: control target
= control target key end

     0   :  { %18 = vsyncpa [#allocation7], 0  ;;  %s1731_s0 = inlined_call_operand.hbm [shape: f32[2,8,16], index: 0, kind: input, shape index: {}]   ;;  %s1732_s1 = inlined_call_operand.hbm [shape: f32[2,8,16], index: 1, kind: input, shape index: {}]   ;;  %s1733_s2 = inlined_call_operand.hbm [shape: f32[2,1,8], index: 2, kind: input, shape index: {}]   ;;  %s1734_s3 = inlined_call_operand.hbm [shape: bf16[16,32], index: 3, kind: input, shape index: {}]   ;;  %s1735_s4 = inlined_call_operand.hbm [shape: f32[1,32], index: 4, kind: input, shape index: {}]   ;;  %s1736_s5 = inlined_call_operand.hbm [shape: bf16[16,32], index: 5, kind: input, shape index: {}]   ;;  %s1737_s6 = inlined_call_operand.hbm [shape: f32[1,32], index: 6, kind: input, shape index: {}]   ;;  %s1738_s7 = inlined_call_operand.hbm [shape: bf16[16,32], index: 7, kind: input, shape index: {}]   ;;  %s1739_s8 = inlined_call_operand.hbm [shape: f32[1,32], index: 8, kind: input, shape index: {}]   ;;  %s1740_s9 = inlined_call_operand.hbm [shape: bf16[32,32], index: 9, kind: input, shape index: {}]   ;;  %s1741_s10 = inlined_call_operand.hbm [shape: f32[1,32], index: 10, kind: input, shape index: {}]   ;;  %s1742_s11 = inlined_call_operand.hbm [shape: f32[1,32], index: 11, kind: input, shape index: {}]   ;;  %s1743_s12 = inlined_call_operand.hbm [shape: f32[1,32], index: 12, kind: input, shape index: {}]   ;;  %s1744_s13 = inlined_call_operand.hbm [shape: f32[2,8,32], index: 13, kind: output, shape index: {}]  }
   0x1   :  { %19 = vsyncpa [#allocation10], 0 }
   0x2   :  { %20 = vsyncpa [#allocation13], 0 }
   0x3   :  { %21 = vsyncpa [#allocation16], 0 }
   0x4   :  { %22 = vsyncpa [#allocation19], 0 }
   0x5   :  { %23 = vsyncpa [#allocation22], 0 }
   0x6   :  { %24 = vsyncpa [#allocation25], 0 }
   0x7   :  { %25 = vsyncpa [#allocation8], 0  ;;  %s1362_s25 = smov [#allocation9]   ;;  %s1363_s27 = smov [#allocation12]  }
   0x8   :  { %s43_s26 = sshll.u32 %s1362_s25, 4  ;;  %s67_s28 = sshll.u32 %s1363_s27, 4  ;;  %s44_s26 = int_to_ptr.vmem [resolvable:$true] %s43_s26  ;;  %s1456_s28 = int_to_ptr.vmem [resolvable:$true] %s67_s28 }
   0x9   :  { %s1038_s14 = scalar_lea.hbm %s1732_s1, 256 }
   0xa   :  { %p1039_p0 = scmp.ne.s32.totalorder %s1732_s1, %s1038_s14  ;;  %p1042_p1 = scmp.lt.u32.totalorder %s1038_s14, %s1732_s1 }
   0xc   :  { %p1044_p2 = pnand %p1042_p1, %p1039_p0 }
   0xe   :  { %1047 = shalt.err (!%p1044_p2)
}
   0xf   :  { %s1048_s19 = scalar_lea.vmem %s44_s26, 256  ;;  %p1053_p4 = scmp.lt.s32.totalorder %s44_s26, %s44_s26 }
  0x10   :  { %p1049_p3 = scmp.ne.s32.totalorder %s44_s26, %s1048_s19  ;;  %p1054_p5 = scmp.lt.s32.totalorder %s1048_s19, %s1048_s19 }
  0x12   :  { %p1055_p6 = por %p1054_p5, %p1053_p4 }
  0x14   :  { %p1056_p7 = pnand %p1055_p6, %p1049_p3 }
  0x16   :  { %1059 = shalt.err (!%p1056_p7)
}
  0x17   :  { %s1364_s20 = smov 128   ;;  %s1365_s21 = smov 8  }
  0x18   :  { %49 = dma.hbm_to_vmem [thread:$0]  %s1732_s1, 256, %s44_s26, [#allocation10], %s1364_s20, %s1364_s20, %s1365_s21  }
  0x19   :  { %s1060_s27 = scalar_lea.hbm %s1734_s3, 128 }
  0x1a   :  { %p1061_p8 = scmp.ne.s32.totalorder %s1734_s3, %s1060_s27  ;;  %p1064_p9 = scmp.lt.u32.totalorder %s1060_s27, %s1734_s3 }
  0x1c   :  { %p1066_p10 = pnand %p1064_p9, %p1061_p8 }
  0x1e   :  { %1069 = shalt.err (!%p1066_p10)
}
  0x1f   :  { %s1070_s16 = scalar_lea.vmem %s1456_s28, 128  ;;  %p1075_p12 = scmp.lt.s32.totalorder %s1456_s28, %s1456_s28 }
  0x20   :  { %p1071_p11 = scmp.ne.s32.totalorder %s1456_s28, %s1070_s16  ;;  %p1076_p13 = scmp.lt.s32.totalorder %s1070_s16, %s1070_s16 }
  0x22   :  { %p1077_p0 = por %p1076_p13, %p1075_p12 }
  0x24   :  { %p1078_p1 = pnand %p1077_p0, %p1071_p11 }
  0x26   :  { %1081 = shalt.err (!%p1078_p1)
}
  0x27   :  { %s1366_s1 = smov 64   ;;  %s1367_s26 = smov 4  }
  0x28   :  { %73 = dma.hbm_to_vmem [thread:$0]  %s1734_s3, 128, %s1456_s28, [#allocation13], %s1366_s1, %s1366_s1, %s1367_s26  }
  0x29   :  { %s1368_s19 = smov [#allocation15]   ;;  %s1369_s23 = smov [#allocation18]  }
  0x2a   :  { %s89_s22 = sshll.u32 %s1368_s19, 4  ;;  %s111_s24 = sshll.u32 %s1369_s23, 4  ;;  %s90_s22 = int_to_ptr.vmem [resolvable:$true] %s89_s22  ;;  %s1493_s24 = int_to_ptr.vmem [resolvable:$true] %s111_s24 }
  0x2b   :  { %s1082_s29 = scalar_lea.hbm %s1736_s5, 128 }
  0x2c   :  { %p1083_p2 = scmp.ne.s32.totalorder %s1736_s5, %s1082_s29  ;;  %p1086_p3 = scmp.lt.u32.totalorder %s1082_s29, %s1736_s5 }
  0x2e   :  { %p1088_p4 = pnand %p1086_p3, %p1083_p2 }
  0x30   :  { %1091 = shalt.err (!%p1088_p4)
}
  0x31   :  { %s1092_s3 = scalar_lea.vmem %s90_s22, 128  ;;  %p1097_p6 = scmp.lt.s32.totalorder %s90_s22, %s90_s22 }
  0x32   :  { %p1093_p5 = scmp.ne.s32.totalorder %s90_s22, %s1092_s3  ;;  %p1098_p7 = scmp.lt.s32.totalorder %s1092_s3, %s1092_s3 }
  0x34   :  { %p1099_p8 = por %p1098_p7, %p1097_p6 }
  0x36   :  { %p1100_p9 = pnand %p1099_p8, %p1093_p5 }
  0x38   :  { %1103 = shalt.err (!%p1100_p9)
}
  0x39   :  { %95 = dma.hbm_to_vmem [thread:$0]  %s1736_s5, 128, %s90_s22, [#allocation16], %s1366_s1, %s1366_s1, %s1367_s26  }
  0x3a   :  { %s1104_s23 = scalar_lea.hbm %s1738_s7, 128 }
  0x3b   :  { %p1105_p10 = scmp.ne.s32.totalorder %s1738_s7, %s1104_s23  ;;  %p1108_p11 = scmp.lt.u32.totalorder %s1104_s23, %s1738_s7 }
  0x3d   :  { %p1110_p12 = pnand %p1108_p11, %p1105_p10 }
  0x3f   :  { %1113 = shalt.err (!%p1110_p12)
}
  0x40   :  { %s1114_s14 = scalar_lea.vmem %s1493_s24, 128  ;;  %p1119_p0 = scmp.lt.s32.totalorder %s1493_s24, %s1493_s24 }
  0x41   :  { %p1115_p13 = scmp.ne.s32.totalorder %s1493_s24, %s1114_s14  ;;  %p1120_p1 = scmp.lt.s32.totalorder %s1114_s14, %s1114_s14 }
  0x43   :  { %p1121_p2 = por %p1120_p1, %p1119_p0 }
  0x45   :  { %p1122_p3 = pnand %p1121_p2, %p1115_p13 }
  0x47   :  { %1125 = shalt.err (!%p1122_p3)
}
  0x48   :  { %117 = dma.hbm_to_vmem [thread:$0]  %s1738_s7, 128, %s1493_s24, [#allocation19], %s1366_s1, %s1366_s1, %s1367_s26  }
  0x49   :  { %s1370_s15 = smov [#allocation21]   ;;  %s1371_s3 = smov [#allocation24]  }
  0x4a   :  { %s133_s16 = sshll.u32 %s1370_s15, 4  ;;  %s156_s28 = sshll.u32 %s1371_s3, 4  ;;  %s134_s16 = int_to_ptr.vmem [resolvable:$true] %s133_s16  ;;  %s157_s28 = int_to_ptr.vmem [resolvable:$true] %s156_s28 }
  0x4b   :  { %s1126_s19 = scalar_lea.hbm %s1740_s9, 256 }
  0x4c   :  { %p1127_p4 = scmp.ne.s32.totalorder %s1740_s9, %s1126_s19  ;;  %p1130_p5 = scmp.lt.u32.totalorder %s1126_s19, %s1740_s9 }
  0x4e   :  { %p1132_p6 = pnand %p1130_p5, %p1127_p4 }
  0x50   :  { %1135 = shalt.err (!%p1132_p6)
}
  0x51   :  { %s1136_s7 = scalar_lea.vmem %s134_s16, 256  ;;  %p1141_p8 = scmp.lt.s32.totalorder %s134_s16, %s134_s16 }
  0x52   :  { %p1137_p7 = scmp.ne.s32.totalorder %s134_s16, %s1136_s7  ;;  %p1142_p9 = scmp.lt.s32.totalorder %s1136_s7, %s1136_s7 }
  0x54   :  { %p1143_p10 = por %p1142_p9, %p1141_p8 }
  0x56   :  { %p1144_p11 = pnand %p1143_p10, %p1137_p7 }
  0x58   :  { %1147 = shalt.err (!%p1144_p11)
}
  0x59   :  { %139 = dma.hbm_to_vmem [thread:$0]  %s1740_s9, 256, %s134_s16, [#allocation22], %s1366_s1, %s1366_s1, %s1367_s26  }
  0x5a   :  { %s1148_s22 = scalar_lea.hbm %s1742_s11, 16 }
  0x5b   :  { %p1149_p12 = scmp.ne.s32.totalorder %s1742_s11, %s1148_s22  ;;  %p1152_p13 = scmp.lt.u32.totalorder %s1148_s22, %s1742_s11 }
  0x5d   :  { %p1154_p0 = pnand %p1152_p13, %p1149_p12 }
  0x5f   :  { %1157 = shalt.err (!%p1154_p0)
}
  0x60   :  { %s1158_s19 = scalar_lea.vmem %s157_s28, 16  ;;  %s1162_s23 = scalar_lea.vmem %s157_s28, 32 }
  0x61   :  { %p1159_p1 = scmp.ne.s32.totalorder %s157_s28, %s1158_s19  ;;  %p1163_p2 = scmp.lt.s32.totalorder %s157_s28, %s157_s28 }
  0x62   :  { %p1164_p3 = scmp.lt.s32.totalorder %s1162_s23, %s1158_s19 }
  0x64   :  { %p1165_p4 = por %p1164_p3, %p1163_p2 }
  0x66   :  { %p1166_p5 = pnand %p1165_p4, %p1159_p1 }
  0x68   :  { %1169 = shalt.err (!%p1166_p5)
}
  0x69   :  { %159 = dma.hbm_to_vmem [thread:$0]  %s1742_s11, 16, %s157_s28, [#allocation25]  }
  0x6a   :  { %s1372_s26 = smov [#allocation6]   ;;  %s1373_s25 = smov [#allocation11]  }
  0x6b   :  { %s31_s16 = sshll.u32 %s1372_s26, 4  ;;  %s55_s27 = sshll.u32 %s1373_s25, 4  ;;  %s32_s16 = int_to_ptr.vmem [resolvable:$true] %s31_s16  ;;  %s1557_s27 = int_to_ptr.vmem [resolvable:$true] %s55_s27 }
  0x6c   :  { %s1170_s24 = scalar_lea.hbm %s1731_s0, 256 }
  0x6d   :  { %p1171_p6 = scmp.ne.s32.totalorder %s1731_s0, %s1170_s24  ;;  %p1174_p7 = scmp.lt.u32.totalorder %s1170_s24, %s1731_s0 }
  0x6f   :  { %p1176_p8 = pnand %p1174_p7, %p1171_p6 }
  0x71   :  { %1179 = shalt.err (!%p1176_p8)
}
  0x72   :  { %s1180_s11 = scalar_lea.vmem %s32_s16, 256  ;;  %p1185_p10 = scmp.lt.s32.totalorder %s32_s16, %s32_s16 }
  0x73   :  { %p1181_p9 = scmp.ne.s32.totalorder %s32_s16, %s1180_s11  ;;  %p1186_p11 = scmp.lt.s32.totalorder %s1180_s11, %s1180_s11 }
  0x75   :  { %p1187_p12 = por %p1186_p11, %p1185_p10 }
  0x77   :  { %p1188_p13 = pnand %p1187_p12, %p1181_p9 }
  0x79   :  { %1191 = shalt.err (!%p1188_p13)
}
  0x7a   :  { %37 = dma.hbm_to_vmem [thread:$0]  %s1731_s0, 256, %s32_s16, [#allocation7], %s1364_s20, %s1364_s20, %s1365_s21  }
  0x7b   :  { %s1192_s18 = scalar_lea.hbm %s1733_s2, 32 }
  0x7c   :  { %p1193_p0 = scmp.ne.s32.totalorder %s1733_s2, %s1192_s18  ;;  %p1196_p1 = scmp.lt.u32.totalorder %s1192_s18, %s1733_s2 }
  0x7e   :  { %p1198_p2 = pnand %p1196_p1, %p1193_p0 }
  0x80   :  { %1201 = shalt.err (!%p1198_p2)
}
  0x81   :  { %s1202_s26 = scalar_lea.vmem %s1557_s27, 32  ;;  %p1207_p4 = scmp.lt.s32.totalorder %s1557_s27, %s1557_s27 }
  0x82   :  { %p1203_p3 = scmp.ne.s32.totalorder %s1557_s27, %s1202_s26  ;;  %p1208_p5 = scmp.lt.s32.totalorder %s1202_s26, %s1202_s26 }
  0x84   :  { %p1209_p6 = por %p1208_p5, %p1207_p4 }
  0x86   :  { %p1210_p7 = pnand %p1209_p6, %p1203_p3 }
  0x88   :  { %1213 = shalt.err (!%p1210_p7)
}
  0x89   :  { %s1374_s0 = smov 16   ;;  %s1375_s16 = smov 1  }
  0x8a   :  { %61 = dma.hbm_to_vmem [thread:$0]  %s1733_s2, 32, %s1557_s27, [#allocation10], %s1374_s0, %s1374_s0, %s1375_s16  }
  0x8b   :  { %s1376_s7 = smov [#allocation14]   ;;  %s1377_s30 = smov [#allocation17]  }
  0x8c   :  { %s80_s24 = sshll.u32 %s1376_s7, 4  ;;  %s102_s14 = sshll.u32 %s1377_s30, 4  ;;  %s81_s24 = int_to_ptr.vmem [resolvable:$true] %s80_s24  ;;  %s103_s14 = int_to_ptr.vmem [resolvable:$true] %s102_s14 }
  0x8d   :  { %s1214_s11 = scalar_lea.hbm %s1735_s4, 16 }
  0x8e   :  { %p1215_p8 = scmp.ne.s32.totalorder %s1735_s4, %s1214_s11  ;;  %p1218_p9 = scmp.lt.u32.totalorder %s1214_s11, %s1735_s4 }
  0x90   :  { %p1220_p10 = pnand %p1218_p9, %p1215_p8 }
  0x92   :  { %1223 = shalt.err (!%p1220_p10)
}
  0x93   :  { %s1224_s2 = scalar_lea.vmem %s81_s24, 16  ;;  %s1228_s27 = scalar_lea.vmem %s81_s24, 32 }
  0x94   :  { %p1225_p11 = scmp.ne.s32.totalorder %s81_s24, %s1224_s2  ;;  %p1229_p12 = scmp.lt.s32.totalorder %s81_s24, %s81_s24 }
  0x95   :  { %p1230_p13 = scmp.lt.s32.totalorder %s1228_s27, %s1224_s2 }
  0x97   :  { %p1231_p0 = por %p1230_p13, %p1229_p12 }
  0x99   :  { %p1232_p1 = pnand %p1231_p0, %p1225_p11 }
  0x9b   :  { %1235 = shalt.err (!%p1232_p1)
}
  0x9c   :  { %83 = dma.hbm_to_vmem [thread:$0]  %s1735_s4, 16, %s81_s24, [#allocation13]  }
  0x9d   :  { %s1236_s1 = scalar_lea.hbm %s1737_s6, 16 }
  0x9e   :  { %p1237_p2 = scmp.ne.s32.totalorder %s1737_s6, %s1236_s1  ;;  %p1240_p3 = scmp.lt.u32.totalorder %s1236_s1, %s1737_s6 }
  0xa0   :  { %p1242_p4 = pnand %p1240_p3, %p1237_p2 }
  0xa2   :  { %1245 = shalt.err (!%p1242_p4)
}
  0xa3   :  { %s1246_s29 = scalar_lea.vmem %s103_s14, 16  ;;  %s1250_s7 = scalar_lea.vmem %s103_s14, 32 }
  0xa4   :  { %p1247_p5 = scmp.ne.s32.totalorder %s103_s14, %s1246_s29  ;;  %p1251_p6 = scmp.lt.s32.totalorder %s103_s14, %s103_s14 }
  0xa5   :  { %p1252_p7 = scmp.lt.s32.totalorder %s1250_s7, %s1246_s29 }
  0xa7   :  { %p1253_p8 = por %p1252_p7, %p1251_p6 }
  0xa9   :  { %p1254_p9 = pnand %p1253_p8, %p1247_p5 }
  0xab   :  { %1257 = shalt.err (!%p1254_p9)
}
  0xac   :  { %105 = dma.hbm_to_vmem [thread:$0]  %s1737_s6, 16, %s103_s14, [#allocation16]  }
  0xad   :  { %s1378_s30 = smov [#allocation20]   ;;  %s1379_s22 = smov [#allocation23]  }
  0xae   :  { %s124_s5 = sshll.u32 %s1378_s30, 4  ;;  %s146_s11 = sshll.u32 %s1379_s22, 4  ;;  %s125_s5 = int_to_ptr.vmem [resolvable:$true] %s124_s5  ;;  %s147_s11 = int_to_ptr.vmem [resolvable:$true] %s146_s11 }
  0xaf   :  { %s1258_s3 = scalar_lea.hbm %s1739_s8, 16 }
  0xb0   :  { %p1259_p10 = scmp.ne.s32.totalorder %s1739_s8, %s1258_s3  ;;  %p1262_p11 = scmp.lt.u32.totalorder %s1258_s3, %s1739_s8 }
  0xb2   :  { %p1264_p12 = pnand %p1262_p11, %p1259_p10 }
  0xb4   :  { %1267 = shalt.err (!%p1264_p12)
}
  0xb5   :  { %s1268_s6 = scalar_lea.vmem %s125_s5, 16  ;;  %s1272_s14 = scalar_lea.vmem %s125_s5, 32 }
  0xb6   :  { %p1269_p13 = scmp.ne.s32.totalorder %s125_s5, %s1268_s6  ;;  %p1273_p0 = scmp.lt.s32.totalorder %s125_s5, %s125_s5 }
  0xb7   :  { %p1274_p1 = scmp.lt.s32.totalorder %s1272_s14, %s1268_s6 }
  0xb9   :  { %p1275_p2 = por %p1274_p1, %p1273_p0 }
  0xbb   :  { %p1276_p3 = pnand %p1275_p2, %p1269_p13 }
  0xbd   :  { %1279 = shalt.err (!%p1276_p3)
}
  0xbe   :  { %127 = dma.hbm_to_vmem [thread:$0]  %s1739_s8, 16, %s125_s5, [#allocation19]  }
  0xbf   :  { %s1280_s26 = scalar_lea.hbm %s1741_s10, 16 }
  0xc0   :  { %p1281_p4 = scmp.ne.s32.totalorder %s1741_s10, %s1280_s26  ;;  %p1284_p5 = scmp.lt.u32.totalorder %s1280_s26, %s1741_s10 }
  0xc2   :  { %p1286_p6 = pnand %p1284_p5, %p1281_p4 }
  0xc4   :  { %1289 = shalt.err (!%p1286_p6)
}
  0xc5   :  { %s1290_s7 = scalar_lea.vmem %s147_s11, 16  ;;  %s1294_s4 = scalar_lea.vmem %s147_s11, 32 }
  0xc6   :  { %p1291_p7 = scmp.ne.s32.totalorder %s147_s11, %s1290_s7  ;;  %p1295_p8 = scmp.lt.s32.totalorder %s147_s11, %s147_s11 }
  0xc7   :  { %p1296_p9 = scmp.lt.s32.totalorder %s1294_s4, %s1290_s7 }
  0xc9   :  { %p1297_p10 = por %p1296_p9, %p1295_p8 }
  0xcb   :  { %p1298_p11 = pnand %p1297_p10, %p1291_p7 }
  0xcd   :  { %1301 = shalt.err (!%p1298_p11)
}
  0xce   :  { %149 = dma.hbm_to_vmem [thread:$0]  %s1741_s10, 16, %s147_s11, [#allocation22]  }
  0xcf   :  { %s1380_s30 = smov [#allocation26]   ;;  %s1302_s15 = scalar_lea.hbm %s1743_s12, 16 }
  0xd0   :  { %s166_s5 = sshll.u32 %s1380_s30, 4  ;;  %p1303_p12 = scmp.ne.s32.totalorder %s1743_s12, %s1302_s15  ;;  %s167_s5 = int_to_ptr.vmem [resolvable:$true] %s166_s5 }
  0xd1   :  { %p1306_p13 = scmp.lt.u32.totalorder %s1302_s15, %s1743_s12 }
  0xd3   :  { %p1308_p0 = pnand %p1306_p13, %p1303_p12 }
  0xd5   :  { %1311 = shalt.err (!%p1308_p0)
}
  0xd6   :  { %s1312_s18 = scalar_lea.vmem %s167_s5, 16  ;;  %s1316_s10 = scalar_lea.vmem %s167_s5, 32 }
  0xd7   :  { %p1313_p1 = scmp.ne.s32.totalorder %s167_s5, %s1312_s18  ;;  %p1317_p2 = scmp.lt.s32.totalorder %s167_s5, %s167_s5 }
  0xd8   :  { %p1318_p3 = scmp.lt.s32.totalorder %s1316_s10, %s1312_s18 }
  0xda   :  { %p1319_p4 = por %p1318_p3, %p1317_p2 }
  0xdc   :  { %p1320_p5 = pnand %p1319_p4, %p1313_p1 }
  0xde   :  { %1323 = shalt.err (!%p1320_p5)
}
  0xdf   :  { %169 = dma.hbm_to_vmem [thread:$0]  %s1743_s12, 16, %s167_s5, [#allocation25]  }
  0xe0   :  { %1346 = dma.done.wait [#allocation7], 256  }
  0xe1   :  { %1347 = vsyncadd [#allocation7], 4294967040 }
  0xe2   :  { %1348 = dma.done.wait [#allocation10], 288  }
  0xe3   :  { %1349 = vsyncadd [#allocation10], 4294967008 }
  0xe4   :  { %1350 = dma.done.wait [#allocation13], 144  }
  0xe5   :  { %1351 = vsyncadd [#allocation13], 4294967152 }
  0xe6   :  { %1352 = dma.done.wait [#allocation16], 144  }
  0xe7   :  { %1353 = vsyncadd [#allocation16], 4294967152 }
  0xe8   :  { %1354 = dma.done.wait [#allocation19], 144  }
  0xe9   :  { %1355 = vsyncadd [#allocation19], 4294967152 }
  0xea   :  { %1356 = dma.done.wait [#allocation22], 272  }
  0xeb   :  { %1357 = vsyncadd [#allocation22], 4294967024 }
  0xec   :  { %1358 = dma.done.wait [#allocation25], 32  }
  0xed   :  { %1359 = vsyncadd [#allocation25], 4294967264  ;;  %v1381_v0 = vmov 0.0   ;;  %vm1382_vm0 = vmmov 0   ;;  %v1009_v1 = vld [vmem:[#allocation12] sm:$0xff]   ;;  %v1010_v2 = vld [vmem:[#allocation15] sm:$0xff]  }
  0xee   :  { %933 = vmatprep.subr.bf16.mxu0 %v1381_v0  ;;  %939 = vmatprep.subr.bf16.mxu1 %v1381_v0  ;;  %v216_v3 = vld [vmem:[#allocation6] sm:$0xff]  ;;  %v217_v4 = vld [vmem:[#allocation6 + $0x8] sm:$0xff]  ;;  %vm234_vm1 = vcmask 130048   ;;  %v337_v5 = vld [vmem:[#allocation9] sm:$0xff]  ;;  %vm279_vm2 = vcmask 261120   ;;  %vm327_vm3 = vcmask 257024  }
  0xef   :  { %935 = vmatprep.mubr.msk.bf16.mxu0 %vm1382_vm0, %v1381_v0  ;;  %941 = vmatprep.mubr.msk.bf16.mxu1 %vm1382_vm0, %v1381_v0  ;;  %v218_v6 = vpack.c.bf16 %v217_v4, %v216_v3  ;;  %v338_v7 = vld [vmem:[#allocation9 + $0x8] sm:$0xff]  ;;  %335 = vst.msk [vmem:[#allocation5] sm:$0xff] %vm279_vm2, %v1381_v0  ;;  %336 = vst.msk [vmem:[#allocation5 + $0x8] sm:$0xff] %vm279_vm2, %v1381_v0  ;;  %v897_v10 = vld [vmem:[#allocation14] ss:$0 sm:$0xff]  ;;  %vm741_vm4 = vcmask 1043456  }
  0xf0   :  { %934 = vmatpush3.bf16.msra.mxu0 %v1009_v1  ;;  %940 = vmatpush3.bf16.msra.mxu1 %v1010_v2  ;;  %v339_v8 = vpack.c.bf16 %v338_v7, %v337_v5  ;;  %v1011_v9 = vld [vmem:[#allocation18] sm:$0xff]   ;;  %v900_v11 = vld [vmem:[#allocation17] ss:$0 sm:$0xff]  ;;  %v1012_v49 = vld [vmem:[#allocation21] sm:$0xff]   ;;  %vm330_vm5 = vcmask 7168   ;;  %vm690_vm6 = vcmask 64512  }
  0xf1   :  { %945 = vmatprep.subr.bf16.mxu0 %v1381_v0  ;;  %951 = vmatprep.subr.bf16.mxu1 %v1381_v0  ;;  %v903_v50 = vld [vmem:[#allocation20] ss:$0 sm:$0xff]  ;;  %v1013_v54 = vld [vmem:[#allocation21 + $0x8] sm:$0xff]   ;;  %333 = vst.msk [vmem:[#allocation4] sm:$0xff] %vm330_vm5, %v1381_v0  ;;  %334 = vst.msk [vmem:[#allocation4 + $0x8] sm:$0xff] %vm330_vm5, %v1381_v0  ;;  %s1385_s12 = smov [#allocation27]  }
  0xf2   :  { %s879_s14 = sshll.u32 %s1385_s12, 4  ;;  %s880_s14 = int_to_ptr.vmem [resolvable:$true] %s879_s14 }
  0xf3   :  { %936 = vmatmul.mubr.msk.bf16.vlgmr.msra.gmra.mrb[0].mxu0 %vm234_vm1, %v218_v6  ;;  %942 = vmatmul.mubr.msk.bf16.vlgmr.msra.gmra.mrb[0].mxu1 %vm234_vm1, %v339_v8  ;;  %s1324_s19 = scalar_lea.vmem %s880_s14, 256  ;;  %p1329_p7 = scmp.lt.s32.totalorder %s880_s14, %s880_s14 }
  0xf4   :  { %947 = vmatprep.mubr.msk.bf16.mxu0 %vm1382_vm0, %v1381_v0  ;;  %955 = vmatprep.mubr.msk.bf16.mxu1 %vm1382_vm0, %v1381_v0  ;;  %p1325_p6 = scmp.ne.s32.totalorder %s880_s14, %s1324_s19  ;;  %p1330_p8 = scmp.lt.s32.totalorder %s1324_s19, %s1324_s19 }
  0xf5   :  { %946 = vmatpush3.bf16.msra.mxu0 %v1011_v9  ;;  %952 = vmatpush3.bf16.msra.mxu1 %v1012_v49 }
  0xf6   :  { %959 = vmatprep.subr.bf16.mxu0 %v1381_v0  ;;  %953 = vmatprep.subr.bf16.mxu1 %v1381_v0  ;;  %p1331_p9 = por %p1330_p8, %p1329_p7 }
  0xf8   :  { %p1332_p10 = pnand %p1331_p9, %p1325_p6 }
  0xf9   :  { %954 = vmatpush3.bf16.msra.mxu1 %v1013_v54 }
  0xfa   :  { %965 = vmatprep.subr.bf16.mxu1 %v1381_v0 }
  0xfb   :  { %948 = vmatmul.mubr.msk.bf16.vlgmr.msra.gmra.mrb[4].mxu0 %vm234_vm1, %v339_v8 }
  0xfc   :  { %961 = vmatprep.mubr.msk.bf16.mxu0 %vm1382_vm0, %v1381_v0 }
 0x1c6   :  { %v272_v12 = vpop.f32.mrb[0].mxu0  ;;  %v393_v14 = vpop.f32.mrb[0].mxu1 }
 0x1c7   :  { %v273_v13 = vadd.f32 %v897_v10, %v272_v12  ;;  %v937_v15 = vpop.f32.mrb[1].mxu0  ;;  %v394_v16 = vadd.f32 %v900_v11, %v393_v14  ;;  %v943_v18 = vpop.f32.mrb[1].mxu1  ;;  %v915_v12 = vld [vmem:[#allocation26] ss:$0 sm:$0xff] }
 0x1c8   :  { %v275_v17 = vpop.f32.mrb[2].mxu0  ;;  %v396_v21 = vpop.f32.mrb[2].mxu1 }
 0x1c9   :  { %v276_v19 = vadd.f32 %v897_v10, %v275_v17  ;;  %v938_v20 = vpop.f32.mrb[3].mxu0  ;;  %v280_v22 = vsel %vm279_vm2, %v273_v13, 0.0  ;;  %v397_v23 = vadd.f32 %v900_v11, %v396_v21  ;;  %v401_v24 = vsel %vm279_vm2, %v394_v16, 0.0  ;;  %v944_v25 = vpop.f32.mrb[3].mxu1  ;;  %v914_v10 = vld [vmem:[#allocation24] ss:$0 sm:$0xff] }
 0x1ca   :  { %281 = vadd.xlane.f32.xlu0 %v280_v22  ;;  %402 = vadd.xlane.f32.xlu1 %v401_v24 }
 0x1cb   :  { %v404_v26 = vsel %vm279_vm2, %v397_v23, 0.0  ;;  %v283_v27 = vsel %vm279_vm2, %v276_v19, 0.0 }
 0x1ce   :  { %284 = vadd.xlane.f32.xlu0 %v283_v27  ;;  %405 = vadd.xlane.f32.xlu1 %v404_v26  ;;  %v495_v48 = vpop.f32.mrb[4].mxu0 }
 0x1cf   :  { %v949_v51 = vpop.f32.mrb[5].mxu0  ;;  %v496_v52 = vadd.f32 %v903_v50, %v495_v48 }
 0x1d0   :  { %v498_v53 = vpop.f32.mrb[6].mxu0  ;;  %v578_v51 = vld [vmem:[#allocation11] sm:$0x1] }
 0x1d1   :  { %v499_v55 = vadd.f32 %v903_v50, %v498_v53  ;;  %v950_v56 = vpop.f32.mrb[7].mxu0  ;;  %v502_v57 = vmax.f32 %v496_v52, 0.0  ;;  %v1383_v50 = vmov -inf   ;;  %v579_v52 = vld [vmem:[#allocation11 + $0x1] sm:$0x1]  ;;  %v308_v53 = vlaneseq }
 0x1d2   :  { %331 = vst.msk [vmem:[#allocation3] sm:$0xff] %vm330_vm5, %v1383_v50  ;;  %332 = vst.msk [vmem:[#allocation3 + $0x8] sm:$0xff] %vm330_vm5, %v1383_v50  ;;  %v832_v50 = vld [vmem:[#allocation5 + $0x8] sm:$0xff] }
 0x1d3   :  { %v503_v58 = vmax.f32 %v499_v55, 0.0  ;;  %v309_v54 = vshrl.u32 %v308_v53, 7 }
 0x1d5   :  { %v504_v59 = vpack.c.bf16 %v503_v58, %v502_v57  ;;  %v310_v57 = vsub.s32 0, %v309_v54 }
 0x1d7   :  { %956 = vmatmul.mubr.msk.bf16.vlgmr.msra.gmra.mrb[4].mxu1 %vm279_vm2, %v504_v59 }
 0x1d8   :  { %967 = vmatprep.mubr.msk.bf16.mxu1 %vm1382_vm0, %v1381_v0 }
 0x257   :  { %v282_v28 = vpop.xlane.xlu0 %281  ;;  %v403_v29 = vpop.xlane.xlu1 %402 }
 0x258   :  { %v287_v30 = vmul.f32 0.03125, %v282_v28  ;;  %v408_v31 = vmul.f32 0.03125, %v403_v29 }
 0x25a   :  { %v289_v32 = vsub.f32 %v273_v13, %v287_v30  ;;  %v410_v33 = vsub.f32 %v394_v16, %v408_v31 }
 0x25b   :  { %v285_v34 = vpop.xlane.xlu0 %284  ;;  %v406_v35 = vpop.xlane.xlu1 %405 }
 0x25c   :  { %v288_v36 = vmul.f32 0.03125, %v285_v34  ;;  %v291_v37 = vmul.f32 %v289_v32, %v289_v32  ;;  %v409_v38 = vmul.f32 0.03125, %v406_v35  ;;  %v412_v41 = vmul.f32 %v410_v33, %v410_v33 }
 0x25e   :  { %v290_v39 = vsub.f32 %v276_v19, %v288_v36  ;;  %v293_v40 = vsel %vm279_vm2, %v291_v37, 0.0  ;;  %v411_v42 = vsub.f32 %v397_v23, %v409_v38  ;;  %v414_v44 = vsel %vm279_vm2, %v412_v41, 0.0  ;;  %v906_v37 = vld [vmem:[#allocation23] ss:$0 sm:$0xff] }
 0x25f   :  { %294 = vadd.xlane.f32.xlu0 %v293_v40 }
 0x260   :  { %v292_v43 = vmul.f32 %v290_v39, %v290_v39  ;;  %v413_v46 = vmul.f32 %v411_v42, %v411_v42 }
 0x262   :  { %v296_v45 = vsel %vm279_vm2, %v292_v43, 0.0  ;;  %v417_v47 = vsel %vm279_vm2, %v413_v46, 0.0 }
 0x263   :  { %415 = vadd.xlane.f32.xlu0 %v414_v44  ;;  %297 = vadd.xlane.f32.xlu1 %v296_v45 }
 0x267   :  { %418 = vadd.xlane.f32.xlu1 %v417_v47 }
 0x2aa   :  { %v565_v38 = vpop.f32.mrb[4].mxu1 }
 0x2ab   :  { %v957_v40 = vpop.f32.mrb[5].mxu1 }
 0x2ac   :  { %v568_v41 = vpop.f32.mrb[6].mxu1 }
 0x2ad   :  { %v569_v43 = vadd.f32 %v906_v37, %v568_v41  ;;  %v958_v44 = vpop.f32.mrb[7].mxu1 }
 0x2af   :  { %v573_v45 = vmax.f32 %v569_v43, 0.0 }
 0x2b1   :  { %v575_v47 = vpack.c.bf16 %v573_v45, %v573_v45 }
 0x2b3   :  { %v789_v49 = vsel %vm741_vm4, %v575_v47, 0 }
 0x2ec   :  { %v295_v60 = vpop.xlane.xlu0 %294 }
 0x2ed   :  { %v299_v61 = vmul.f32 0.03125, %v295_v60 }
 0x2ef   :  { %v301_v62 = vadd.f32 1e-05, %v299_v61 }
 0x2f0   :  { %v298_v63 = vpop.xlane.xlu1 %297  ;;  %v416_v1 = vpop.xlane.xlu0 %415 }
 0x2f1   :  { %1014 = vrsqrt.f32 %v301_v62  ;;  %v300_v2 = vmul.f32 0.03125, %v298_v63  ;;  %v420_v3 = vmul.f32 0.03125, %v416_v1 }
 0x2f3   :  { %v302_v4 = vadd.f32 1e-05, %v300_v2  ;;  %v422_v5 = vadd.f32 1e-05, %v420_v3 }
 0x2f4   :  { %v419_v6 = vpop.xlane.xlu1 %418 }
 0x2f5   :  { %1016 = vrsqrt.f32 %v302_v4  ;;  %v421_v7 = vmul.f32 0.03125, %v419_v6 }
 0x2f6   :  { %1018 = vrsqrt.f32 %v422_v5 }
 0x2f7   :  { %v423_v8 = vadd.f32 1e-05, %v421_v7 }
 0x2f9   :  { %1020 = vrsqrt.f32 %v423_v8 }
 0x2fa   :  { %1022 = vlog2.f32 %v578_v51 }
 0x2fb   :  { %v1015_v9 = vpop.eup %1014  ;;  %1024 = vlog2.f32 %v579_v52 }
 0x2fc   :  { %v305_v11 = vmul.f32 %v1015_v9, %v289_v32 }
 0x2fe   :  { %v313_v13 = vmul.f32 %v914_v10, %v305_v11  ;;  %v688_v11 = vld [vmem:[#allocation3] sm:$0xff] }
 0x2ff   :  { %v1017_v14 = vpop.eup %1016 }
 0x300   :  { %v1019_v15 = vpop.eup %1018  ;;  %v306_v16 = vmul.f32 %v1017_v14, %v290_v39  ;;  %v321_v17 = vadd.f32 %v915_v12, %v313_v13  ;;  %v566_v39 = vadd.f32 %v906_v37, %v565_v38  ;;  %v689_v14 = vld [vmem:[#allocation3 + $0x8] sm:$0xff]  ;;  %v722_v37 = vld [vmem:[#allocation4 + $0x8] sm:$0xff] }
 0x301   :  { %v426_v18 = vmul.f32 %v1019_v15, %v410_v33 }
 0x302   :  { %v314_v19 = vmul.f32 %v914_v10, %v306_v16  ;;  %v323_v20 = vmul.f32 0.17677669, %v321_v17 }
 0x303   :  { %v1021_v21 = vpop.eup %1020  ;;  %v434_v22 = vmul.f32 %v914_v10, %v426_v18 }
 0x304   :  { %v322_v23 = vadd.f32 %v915_v12, %v314_v19  ;;  %v325_v24 = vpack.c.bf16 %v323_v20, %v323_v20  ;;  %v427_v25 = vmul.f32 %v1021_v21, %v411_v42  ;;  %v572_v42 = vmax.f32 %v566_v39, 0.0  ;;  %v1023_v55 = vpop.eup %1022 }
 0x305   :  { %v442_v26 = vadd.f32 %v915_v12, %v434_v22  ;;  %v1025_v56 = vpop.eup %1024  ;;  %v581_v58 = vmul.f32 0.6931472, %v1023_v55 }
 0x306   :  { %v324_v27 = vmul.f32 0.17677669, %v322_v23  ;;  %328 = vst.msk [vmem:[#allocation2] sm:$0xf] %vm327_vm3, %v325_v24  ;;  %v435_v28 = vmul.f32 %v914_v10, %v427_v25  ;;  %v574_v46 = vpack.c.bf16 %v572_v42, %v572_v42  ;;  %v583_v59 = vmul.f32 0.6931472, %v1025_v56 }
 0x307   :  { %v444_v29 = vpack.c.bf16 %v442_v26, %v442_v26  ;;  %v589_v60 = vrot.slane %v581_v58, %v310_v57  ;;  %v1384_v10 = vmov 0  }
 0x308   :  { %v326_v30 = vpack.c.bf16 %v324_v27, %v324_v27  ;;  %v443_v31 = vadd.f32 %v915_v12, %v435_v28  ;;  %v743_v48 = vsel %vm741_vm4, %v574_v46, 0  ;;  %v593_v62 = vrot.slane %v583_v59, %v310_v57  ;;  %1007 = vset.pattern.permute.xlu0 %v1384_v10  ;;  %1008 = vset.pattern.permute.xlu1 %v1384_v10 }
 0x309   :  { %v600_v32 = vsel %vm279_vm2, %v444_v29, 0 }
 0x30a   :  { %329 = vst.msk [vmem:[#allocation2 + $0x4] sm:$0xf] %vm327_vm3, %v326_v30  ;;  %960 = vmatpush3.bf16.xpose.msra.mxu0 %v600_v32  ;;  %v445_v33 = vpack.c.bf16 %v443_v31, %v443_v31 }
 0x30b   :  { %971 = vmatprep.subr.bf16.mxu0 %v1381_v0 }
 0x30c   :  { %v646_v34 = vsel %vm279_vm2, %v445_v33, 0 }
 0x30d   :  { %966 = vmatpush3.bf16.xpose.msra.mxu1 %v646_v34  ;;  %v576_v35 = vld [vmem:[#allocation2] sm:$0xf] }
 0x30e   :  { %977 = vmatprep.subr.bf16.mxu1 %v1381_v0 }
 0x311   :  { %962 = vmatmul.mubr.msk.bf16.vlgmr.msra.gmra.mrb[8].mxu0 %vm279_vm2, %v576_v35  ;;  %v577_v36 = vld [vmem:[#allocation2 + $0x4] sm:$0xf]  ;;  %v721_v35 = vld [vmem:[#allocation4] sm:$0xff] }
 0x312   :  { %973 = vmatprep.mubr.msk.bf16.mxu0 %vm1382_vm0, %v1381_v0  ;;  %972 = vmatpush3.bf16.msra.mxu0 %v743_v48  ;;  %v831_v48 = vld [vmem:[#allocation5] sm:$0xff] }
 0x314   :  { %968 = vmatmul.mubr.msk.bf16.vlgmr.msra.gmra.mrb[8].mxu1 %vm279_vm2, %v577_v36 }
 0x315   :  { %979 = vmatprep.mubr.msk.bf16.mxu1 %vm1382_vm0, %v1381_v0  ;;  %978 = vmatpush3.bf16.msra.mxu1 %v789_v49 }
 0x3e4   :  { %v636_v61 = vpop.f32.mrb[8].mxu0 }
 0x3e5   :  { %v637_v63 = vadd.f32 %v636_v61, %v589_v60  ;;  %v963_v1 = vpop.f32.mrb[9].mxu0 }
 0x3e6   :  { %v639_v2 = vpop.f32.mrb[10].mxu0 }
 0x3e7   :  { %v964_v3 = vpop.f32.mrb[11].mxu0  ;;  %v682_v0 = vpop.f32.mrb[8].mxu1  ;;  %v691_v4 = vsel %vm690_vm6, %v637_v63, -inf }
 0x3e8   :  { %v683_v5 = vadd.f32 %v682_v0, %v593_v62  ;;  %692 = vmax.xlane.f32.xlu0 %v691_v4  ;;  %v969_v6 = vpop.f32.mrb[9].mxu1 }
 0x3e9   :  { %v685_v7 = vpop.f32.mrb[10].mxu1 }
 0x3ea   :  { %v970_v8 = vpop.f32.mrb[11].mxu1  ;;  %v694_v9 = vsel %vm690_vm6, %v683_v5, -inf }
 0x3eb   :  { %695 = vmax.xlane.f32.xlu1 %v694_v9 }
 0x475   :  { %v693_v12 = vpop.xlane.xlu0 %692 }
 0x476   :  { %v697_v13 = vmax.f32 %v688_v11, %v693_v12 }
 0x478   :  { %v699_v15 = vsub.f32 %v688_v11, %v697_v13  ;;  %849 = vst.msk [vmem:[#allocation3] sm:$0xff] %vm330_vm5, %v697_v13  ;;  %707 = vperm.xlu0 %1007, %v697_v13   ;;  %v696_v16 = vpop.xlane.xlu1 %695 }
 0x479   :  { %v698_v17 = vmax.f32 %v689_v14, %v696_v16 }
 0x47a   :  { %v701_v29 = vmul.f32 1.442695, %v699_v15 }
 0x47b   :  { %v700_v18 = vsub.f32 %v689_v14, %v698_v17  ;;  %850 = vst.msk [vmem:[#allocation3 + $0x8] sm:$0xff] %vm330_vm5, %v698_v17  ;;  %712 = vperm.xlu1 %1008, %v698_v17  }
 0x47d   :  { %v703_v32 = vmul.f32 1.442695, %v700_v18 }
 0x4f7   :  { %v708_v19 = vpop.permute.xlu0 %707 }
 0x4f8   :  { %v715_v20 = vsub.f32 %v637_v63, %v708_v19 }
 0x4fa   :  { %v717_v21 = vmul.f32 1.442695, %v715_v20  ;;  %v713_v22 = vpop.permute.xlu1 %712 }
 0x4fb   :  { %v716_v23 = vsub.f32 %v683_v5, %v713_v22 }
 0x4fc   :  { %1026 = vpow2.f32 %v717_v21 }
 0x4fd   :  { %v719_v24 = vmul.f32 1.442695, %v716_v23 }
 0x4ff   :  { %1028 = vpow2.f32 %v719_v24 }
 0x500   :  { %1030 = vpow2.f32 %v701_v29 }
 0x501   :  { %1032 = vpow2.f32 %v703_v32 }
 0x506   :  { %v1027_v25 = vpop.eup %1026 }
 0x507   :  { %v725_v26 = vsel %vm690_vm6, %v1027_v25, 0.0  ;;  %v736_v27 = vpack.c.bf16 %v1027_v25, %v1027_v25 }
 0x508   :  { %726 = vadd.xlane.f32.xlu1 %v725_v26 }
 0x509   :  { %v1029_v28 = vpop.eup %1028  ;;  %974 = vmatmul.mubr.msk.bf16.vlgmr.msra.gmra.mrb[12].mxu0 %vm690_vm6, %v736_v27 }
 0x50a   :  { %v728_v30 = vsel %vm690_vm6, %v1029_v28, 0.0  ;;  %v737_v31 = vpack.c.bf16 %v1029_v28, %v1029_v28  ;;  %v1031_v33 = vpop.eup %1030 }
 0x50b   :  { %729 = vadd.xlane.f32.xlu0 %v728_v30  ;;  %v1033_v34 = vpop.eup %1032  ;;  %v723_v36 = vmul.f32 %v1031_v33, %v721_v35 }
 0x50c   :  { %980 = vmatmul.mubr.msk.bf16.vlgmr.msra.gmra.mrb[12].mxu1 %vm690_vm6, %v737_v31  ;;  %v724_v40 = vmul.f32 %v1033_v34, %v722_v37 }
 0x519   :  { %835 = vperm.xlu1 %1008, %v1031_v33  }
 0x51d   :  { %840 = vperm.xlu1 %1008, %v1033_v34  }
 0x595   :  { %v727_v38 = vpop.xlane.xlu1 %726 }
 0x596   :  { %v731_v39 = vadd.f32 %v727_v38, %v723_v36 }
 0x598   :  { %734 = vst.msk [vmem:[#allocation4] sm:$0xff] %vm330_vm5, %v731_v39  ;;  %v730_v41 = vpop.xlane.xlu0 %729 }
 0x599   :  { %v732_v42 = vadd.f32 %v730_v41, %v724_v40  ;;  %v836_v47 = vpop.permute.xlu1 %835 }
 0x59a   :  { %v843_v49 = vmul.f32 %v836_v47, %v831_v48 }
 0x59b   :  { %735 = vst.msk [vmem:[#allocation4 + $0x8] sm:$0xff] %vm330_vm5, %v732_v42 }
 0x59d   :  { %v841_v51 = vpop.permute.xlu1 %840 }
 0x59e   :  { %v844_v55 = vmul.f32 %v841_v51, %v832_v50 }
 0x59f   :  { %v854_v43 = vld [vmem:[#allocation4] sm:$0xff] }
 0x5a0   :  { %1034 = vrcp.f32 %v854_v43 }
 0x5a2   :  { %v855_v44 = vld [vmem:[#allocation4 + $0x8] sm:$0xff] }
 0x5a3   :  { %1036 = vrcp.f32 %v855_v44 }
 0x5aa   :  { %v1035_v45 = vpop.eup %1034 }
 0x5ab   :  { %862 = vperm.xlu1 %1008, %v1035_v45  }
 0x5ad   :  { %v1037_v46 = vpop.eup %1036 }
 0x5ae   :  { %867 = vperm.xlu0 %1007, %v1037_v46  }
 0x5dc   :  { %v779_v52 = vpop.f32.mrb[12].mxu0 }
 0x5dd   :  { %v845_v53 = vadd.f32 %v843_v49, %v779_v52  ;;  %v975_v54 = vpop.f32.mrb[13].mxu0 }
 0x5de   :  { %v782_v56 = vpop.f32.mrb[14].mxu0 }
 0x5df   :  { %847 = vst.msk [vmem:[#allocation5] sm:$0xff] %vm279_vm2, %v845_v53  ;;  %v976_v57 = vpop.f32.mrb[15].mxu0  ;;  %v825_v58 = vpop.f32.mrb[12].mxu1 }
 0x5e0   :  { %v846_v59 = vadd.f32 %v844_v55, %v825_v58  ;;  %v981_v60 = vpop.f32.mrb[13].mxu1 }
 0x5e1   :  { %v828_v61 = vpop.f32.mrb[14].mxu1 }
 0x5e2   :  { %848 = vst.msk [vmem:[#allocation5 + $0x8] sm:$0xff] %vm279_vm2, %v846_v59  ;;  %v982_v62 = vpop.f32.mrb[15].mxu1 }
 0x5e6   :  { %v858_v1 = vld [vmem:[#allocation5] sm:$0xff] }
 0x5e9   :  { %v859_v0 = vld [vmem:[#allocation5 + $0x8] sm:$0xff] }
 0x62a   :  { %v863_v63 = vpop.permute.xlu1 %862 }
 0x62b   :  { %v870_v2 = vmul.f32 %v863_v63, %v858_v1 }
 0x62d   :  { %872 = vst.msk [vmem:[#allocation27] sm:$0xff] %vm279_vm2, %v870_v2  ;;  %v868_v3 = vpop.permute.xlu0 %867 }
 0x62e   :  { %v871_v4 = vmul.f32 %v868_v3, %v859_v0 }
 0x630   :  { %873 = vst.msk [vmem:[#allocation27 + $0x8] sm:$0xff] %vm279_vm2, %v871_v4 }
 0x631   :  { %1335 = shalt.err (!%p1332_p10)
}
 0x632   :  { %s1336_s1 = scalar_lea.hbm %s1744_s13, 256 }
 0x633   :  { %p1337_p11 = scmp.ne.s32.totalorder %s1744_s13, %s1336_s1  ;;  %p1340_p12 = scmp.lt.u32.totalorder %s1336_s1, %s1744_s13 }
 0x635   :  { %p1342_p13 = pnand %p1340_p12, %p1337_p11 }
 0x637   :  { %1345 = shalt.err (!%p1342_p13)
}
 0x638   :  { %885 = dma.vmem_to_hbm [thread:$0]  %s880_s14, 256, %s1744_s13, [#allocation8], %s1364_s20, %s1364_s20, %s1365_s21  }
 0x639   :  { %1360 = dma.done.wait [#allocation8], 256  }
 0x63a   :  { %1361 = vsyncadd [#allocation8], 4294967040 }
 0x63b   :  { %889 = vsyncpa [#allocation7], 1 }
 0x63c   :  { %890 = vsyncpa [#allocation10], 1 }
 0x63d   :  { %891 = vsyncpa [#allocation13], 1 }
 0x63e   :  { %892 = vsyncpa [#allocation16], 1 }
 0x63f   :  { %893 = vsyncpa [#allocation19], 1 }
 0x640   :  { %894 = vsyncpa [#allocation22], 1 }
 0x641   :  { %895 = vsyncpa [#allocation25], 1 }
 0x642   :  { %896 = vsyncpa [#allocation8], 1 }

</bundles_post_ra>
